<compile_context>
chip_gen: v7x
topology: tpu7x:2x2x1
jax: 0.10.0
libtpu: 0.0.40
codegen_flags: <defaults>
</compile_context>

<pallas_src>
import jax
import jax.numpy as jnp
from jax.experimental import pallas as pl
from jax.experimental.pallas import tpu as pltpu


def _round_up(x, m):
    return (x + m - 1) // m * m


def _cdiv(a, b):
    return -(-a // b)


def _tpu_budget():
    """(tile_hw, vmem_limit_bytes), gated per generation (v7x has 64 MiB VMEM)."""
    try:
        vmem = int(pltpu.get_tpu_info().vmem_capacity_bytes)
    except Exception:
        vmem = 64 * 1024 * 1024            # conservative: assume v7x-sized part
    if vmem >= 128 * 1024 * 1024:          # v5e / v6e
        return 8192, 64 * 1024 * 1024
    return 4096, 32 * 1024 * 1024          # v7x-safe


def _conv_bn_lrelu_kernel(x_ref, w_ref, shift_ref, o_ref):
    # x_ref:     (1, Cin, thw)   bf16 pixels, flattened spatial on lanes
    # w_ref:     (tco, Cin)      bf16 1x1 conv weight with BN scale folded in
    # shift_ref: (tco, 1)        f32 folded conv-bias + BN shift
    # o_ref:     (1, tco, thw)   bf16 lane-dense output tile
    y = jnp.dot(w_ref[...], x_ref[0], preferred_element_type=jnp.float32)
    y = y + shift_ref[...]                                    # lane-broadcast
    o_ref[0] = jnp.maximum(y, 0.1 * y).astype(o_ref.dtype)    # LeakyReLU(0.1)


def _fused_conv_bn_lrelu(x3, w2d, shift, *, y_dtype, tile_hw, vmem_limit,
                         min_grid_steps=4):
    """x3: (N, Cin, HWp); w2d: (Cout, Cin); shift: (Cout, 1) f32."""
    N, Cin, HWp = x3.shape
    Cout = w2d.shape[0]

    # Balanced spatial tiling so the trailing tile is not mostly padding.
    n_sp = _cdiv(HWp, min(tile_hw, HWp))
    thw = _round_up(_cdiv(HWp, n_sp), 128)
    n_sp = _cdiv(HWp, thw)

    # Ensure enough grid steps for v7x's two TensorCores / the pipeliner at
    # small-batch, small-spatial YOLO shapes.
    tco = Cout
    if N * n_sp < min_grid_steps and Cout % 256 == 0:
        tco = 128                                   # parallel Cout split
    n_co = Cout // tco
    if N * n_co * n_sp < min_grid_steps and HWp > 128:
        want_sp = min(HWp // 128, _cdiv(min_grid_steps, N * n_co))
        if want_sp > n_sp:
            thw = _round_up(_cdiv(HWp, want_sp), 128)
            n_sp = _cdiv(HWp, thw)

    grid = (N, n_co, n_sp)
    grid_spec = pltpu.PrefetchScalarGridSpec(
        num_scalar_prefetch=0,
        grid=grid,
        in_specs=[
            pl.BlockSpec((1, Cin, thw), lambda n, c, j: (n, 0, j)),
            pl.BlockSpec((tco, Cin), lambda n, c, j: (c, 0)),
            pl.BlockSpec((tco, 1), lambda n, c, j: (c, 0)),
        ],
        out_specs=pl.BlockSpec((1, tco, thw), lambda n, c, j: (n, c, j)),
    )
    return pl.pallas_call(
        _conv_bn_lrelu_kernel,
        out_shape=jax.ShapeDtypeStruct((N, Cout, HWp), y_dtype),
        grid_spec=grid_spec,
        compiler_params=pltpu.CompilerParams(
            dimension_semantics=("parallel", "parallel", "parallel"),
            vmem_limit_bytes=vmem_limit,
        ),
    )(x3, w2d, shift)


def upsample_block(x, feature, params, *, eps=1e-5, tile_hw=None,
                   vmem_limit_bytes=None, use_bf16_matmul=True,
                   y_dtype=jnp.bfloat16, out_dtype=None):
    """x: (N, channel2, H, W); feature: (N, Cf, 2H, 2W); NCHW throughout.

    out_dtype=None keeps the concat (and `feature`) in feature.dtype so the
    skip connection is never downcast; pass jnp.bfloat16 to also halve the
    final (largest) HBM pass when downstream tolerates it.
    """
    w, b, gamma, beta, running_mean, running_var = params
    N, Cin, H, W = x.shape
    Cout = w.shape[0]
    if b is None:
        b = jnp.zeros((Cout,), jnp.float32)

    if tile_hw is None or vmem_limit_bytes is None:
        d_tile, d_vmem = _tpu_budget()
        tile_hw = d_tile if tile_hw is None else tile_hw
        vmem_limit_bytes = d_vmem if vmem_limit_bytes is None else vmem_limit_bytes

    # Fold eval-mode BatchNorm (+ conv bias) into the weight and one shift.
    # TODO(synk): training-mode BatchNorm (batch statistics) not implemented;
    # eval-mode running-stat folding is used instead.
    scale = gamma / jnp.sqrt(running_var + eps)                   # (Cout,)
    cdt = jnp.bfloat16 if use_bf16_matmul else jnp.float32
    w2d = (w.reshape(Cout, Cin) * scale[:, None]).astype(cdt)
    shift = ((b - running_mean) * scale + beta).reshape(Cout, 1).astype(jnp.float32)

    # Flatten spatial (free reshape), cast activations to the matmul dtype in
    # the wrapper (fuses with the pad), pad to a lane multiple.  Handles
    # arbitrary H*W (e.g. 13x13, 26x26).
    HW = H * W
    HWp = _round_up(HW, 128)
    x3 = x.reshape(N, Cin, HW).astype(cdt)
    if HWp != HW:
        x3 = jnp.pad(x3, ((0, 0), (0, 0), (0, HWp - HW)))

    y3 = _fused_conv_bn_lrelu(x3, w2d, shift, y_dtype=y_dtype,
                              tile_hw=tile_hw, vmem_limit=vmem_limit_bytes)
    if HWp != HW:
        y3 = y3[..., :HW]
    y = y3.reshape(N, Cout, H, W)

    # 2x nearest upsample + channel concat: pure data movement on bf16 y;
    # XLA fuses the broadcast/reshape into the concat write.
    y_up = jnp.broadcast_to(
        y[:, :, :, None, :, None], (N, Cout, H, 2, W, 2)
    ).reshape(N, Cout, 2 * H, 2 * W)
    out_dt = feature.dtype if out_dtype is None else out_dtype
    return jnp.concatenate([y_up.astype(out_dt), feature.astype(out_dt)], axis=1)


def _reference(x, feature, params, eps=1e-5):
    """Pure-JAX f32 reference matching the PyTorch module (eval mode)."""
    w, b, gamma, beta, mean, var = params
    Cout, Cin = w.shape[0], w.shape[1]
    y = jnp.einsum("oc,nchw->nohw", w.reshape(Cout, Cin), x)
    y = y + b[None, :, None, None]
    y = (y - mean[None, :, None, None]) / jnp.sqrt(var[None, :, None, None] + eps)
    y = gamma[None, :, None, None] * y + beta[None, :, None, None]
    y = jnp.where(y > 0, y, 0.1 * y)
    y = jnp.repeat(jnp.repeat(y, 2, axis=2), 2, axis=3)
    return jnp.concatenate([y, feature], axis=1)


def init_params(key, channel1, channel2):
    """Deterministic parameter init mimicking the module shapes."""
    k_w, k_b, k_g, k_be, k_m, k_v = jax.random.split(key, 6)
    w = jax.random.normal(k_w, (channel1, channel2, 1, 1), jnp.float32) * 0.1
    b = jax.random.normal(k_b, (channel1,), jnp.float32) * 0.1
    gamma = 1.0 + 0.1 * jax.random.normal(k_g, (channel1,), jnp.float32)
    beta = 0.1 * jax.random.normal(k_be, (channel1,), jnp.float32)
    running_mean = 0.1 * jax.random.normal(k_m, (channel1,), jnp.float32)
    running_var = jnp.abs(1.0 + 0.1 * jax.random.normal(k_v, (channel1,),
                                                        jnp.float32))
    return (w, b, gamma, beta, running_mean, running_var)


if __name__ == "__main__":
    channel1, channel2 = 4, 8          # conv: channel2 -> channel1
    N, H, W = 2, 16, 16
    Cf = 4                              # feature channels

    key = jax.random.PRNGKey(0)
    k_x, k_f, k_p = jax.random.split(key, 3)
    x = jax.random.normal(k_x, (N, channel2, H, W), jnp.float32)
    feature = jax.random.normal(k_f, (N, Cf, 2 * H, 2 * W), jnp.float32)
    params = init_params(k_p, channel1, channel2)

    out = jax.block_until_ready(upsample_block(x, feature, params))
    assert out.shape == (N, channel1 + Cf, 2 * H, 2 * W), out.shape
    assert out.dtype == jnp.float32

    ref = jax.block_until_ready(_reference(x, feature, params))
    max_err = float(jnp.max(jnp.abs(out - ref)))
    assert max_err < 3e-2, max_err      # bf16 matmul in/out, f32 accumulation

    print("KERNEL_OK")
</pallas_src>

<mosaic_0001>
module attributes {stable_mosaic.version = 11 : i64} {
  func.func @_conv_bn_lrelu_kernel(%arg0: i32, %arg1: i32, %arg2: i32, %arg3: memref<1x8x128xbf16, #tpu.memory_space<vmem>>, %arg4: memref<4x8xbf16, #tpu.memory_space<vmem>>, %arg5: memref<4x1xf32, #tpu.memory_space<vmem>>, %arg6: memref<1x4x128xbf16, #tpu.memory_space<vmem>>) attributes {dimension_semantics = [#tpu.dimension_semantics<parallel>, #tpu.dimension_semantics<parallel>, #tpu.dimension_semantics<parallel>], iteration_bounds = array<i64: 2, 1, 2>, scalar_prefetch = 0 : i64, scratch_operands = 0 : i64, tpu.core_type = #tpu.core_type<tc>, window_params = [{transform_indices = @transform_0, window_bounds = array<i64: 1, 8, 128>}, {transform_indices = @transform_1, window_bounds = array<i64: 4, 8>}, {transform_indices = @transform_2, window_bounds = array<i64: 4, 1>}, {transform_indices = @transform_3, window_bounds = array<i64: 1, 4, 128>}]} {
    %c0 = arith.constant 0 : index
    %c0_0 = arith.constant 0 : index
    %0 = vector.load %arg4[%c0, %c0_0] : memref<4x8xbf16, #tpu.memory_space<vmem>>, vector<4x8xbf16>
    %c0_1 = arith.constant 0 : index
    %c0_2 = arith.constant 0 : index
    %c0_3 = arith.constant 0 : index
    %1 = vector.load %arg3[%c0_1, %c0_2, %c0_3] : memref<1x8x128xbf16, #tpu.memory_space<vmem>>, vector<1x8x128xbf16>
    %2 = vector.shape_cast %1 : vector<1x8x128xbf16> to vector<8x128xbf16>
    %cst = arith.constant dense<0.000000e+00> : vector<4x128xf32>
    %3 = tpu.matmul %0, %2, %cst {dimension_numbers = #tpu.dot_dimension_numbers<[1], [0], [0], [1], [0, 0, 1, 1], [], []>} : vector<4x8xbf16>, vector<8x128xbf16>, vector<4x128xf32> -> vector<4x128xf32>
    %c0_4 = arith.constant 0 : index
    %c0_5 = arith.constant 0 : index
    %4 = vector.load %arg5[%c0_4, %c0_5] : memref<4x1xf32, #tpu.memory_space<vmem>>, vector<4x1xf32>
    %5 = vector.broadcast %4 : vector<4x1xf32> to vector<4x128xf32>
    %6 = arith.addf %3, %5 : vector<4x128xf32>
    %cst_6 = arith.constant 1.000000e-01 : f32
    %7 = vector.broadcast %cst_6 : f32 to vector<4x128xf32>
    %8 = arith.mulf %7, %6 : vector<4x128xf32>
    %9 = arith.maximumf %6, %8 : vector<4x128xf32>
    %10 = arith.truncf %9 : vector<4x128xf32> to vector<4x128xbf16>
    %c0_7 = arith.constant 0 : index
    %c0_8 = arith.constant 0 : index
    %c0_9 = arith.constant 0 : index
    %11 = vector.load %arg6[%c0_7, %c0_8, %c0_9] : memref<1x4x128xbf16, #tpu.memory_space<vmem>>, vector<1x4x128xbf16>
    %12 = vector.shape_cast %11 : vector<1x4x128xbf16> to vector<4x128xbf16>
    %13 = vector.shape_cast %10 : vector<4x128xbf16> to vector<1x4x128xbf16>
    tpu.vector_store %arg6[%c0_7, %c0_8, %c0_9], %13 {strides = array<i32>} : memref<1x4x128xbf16, #tpu.memory_space<vmem>>, vector<1x4x128xbf16>,
    return
  }
  func.func @transform_0(%arg0: i32, %arg1: i32, %arg2: i32) -> (i32, i32, i32) {
    %c0_i32 = arith.constant 0 : i32
    %c0_i32_0 = arith.constant 0 : i32
    return %arg0, %c0_i32, %arg2 : i32, i32, i32
  }
  func.func @transform_1(%arg0: i32, %arg1: i32, %arg2: i32) -> (i32, i32) {
    %c0_i32 = arith.constant 0 : i32
    %c0_i32_0 = arith.constant 0 : i32
    return %arg1, %c0_i32 : i32, i32
  }
  func.func @transform_2(%arg0: i32, %arg1: i32, %arg2: i32) -> (i32, i32) {
    %c0_i32 = arith.constant 0 : i32
    %c0_i32_0 = arith.constant 0 : i32
    return %arg1, %c0_i32 : i32, i32
  }
  func.func @transform_3(%arg0: i32, %arg1: i32, %arg2: i32) -> (i32, i32, i32) {
    %c0_i32 = arith.constant 0 : i32
    return %arg0, %arg1, %arg2 : i32, i32, i32
  }
}

</mosaic_0001>

<bundles_post_ra>
// kernel: tpu_custom_call.1
= control target key start
LH: loop header
LB: loop body
LE: loop exit
PB: predicated region body
PF: predicated region fallthrough
CT: control target
= control target key end

     0   :  { %8 = vsyncpa [#allocation3], 0  ;;  %s910_s0 = inlined_call_operand.hbm [shape: bf16[2,8,256], index: 0, kind: input, shape index: {}]   ;;  %s911_s1 = inlined_call_operand.vmem [shape: bf16[4,8], index: 1, kind: input, shape index: {}]   ;;  %s912_s2 = inlined_call_operand.vmem [shape: f32[4,1], index: 2, kind: input, shape index: {}]   ;;  %s913_s3 = inlined_call_operand.hbm [shape: bf16[2,4,256], index: 3, kind: output, shape index: {}]  }
   0x1   :  { %10 = vsyncpa [#allocation3 + $0x1], 0 }
   0x2   :  { %11 = vsyncpa [#allocation4], 0 }
   0x3   :  { %13 = vsyncpa [#allocation4 + $0x1], 0  ;;  %s709_s12 = smov 0   ;;  %s711_s13 = smov 0  }
   0x4   :  { %s713_s14 = smov 0   ;;  %s715_s15 = smov 0  }
   0x5   :  { %s717_s16 = smov 0   ;;  %s719_s17 = smov 0  }
   0x6   :  { %s721_s18 = smov 0   ;;  %s723_s19 = smov 0  }
   0x7 LB: > { %s446_s20 = sadd.s32 4294967295, %s682_s19   ;;  %s447_s21 = sadd.s32 4294967294, %s682_s19   ;;  %s682_s19 = sphi %s723_s19, %s19_s19   ;;  %s678_s18 = sphi %s721_s18, %s930_s18   ;;  %s674_s17 = sphi %s719_s17, %s929_s17   ;;  %s670_s16 = sphi %s717_s16, %s928_s16   ;;  %s666_s15 = sphi %s715_s15, %s927_s15   ;;  %s662_s14 = sphi %s713_s14, %s926_s14   ;;  %s658_s13 = sphi %s711_s13, %s925_s13   ;;  %s654_s12 = sphi %s709_s12, %s924_s12  }
   0x8   : > { %s31_s22 = sadd.s32 1, %s674_s17  ;;  %s38_s23 = sadd.s32 1, %s678_s18 }
   0x9   : > { %p32_p0 = scmp.ge.s32.totalorder %s31_s22, 2  ;;  %s47_s24 = sadd.s32 1, %s662_s14 }
   0xa   : > { %p54_p1 = scmp.ne.s32.totalorder %s662_s14, %s658_s13  ;;  %p55_p2 = scmp.eq.s32.totalorder %s682_s19, 0 }
   0xb   : > { %s932_s22 = smov (%p32_p0, %s31_s22), 0  ;;  %s934_s23 = smov (!%p32_p0, %s38_s23), %s678_s18 }
   0xc   : > { %s43_s25 = ssub.s32 %s674_s17, %s932_s22  ;;  %p762_p3 = por %p55_p2, %p54_p1 }
   0xd   : > { %p40_p4 = scmp.ge.s32.totalorder %s934_s23, 2  ;;  %p60_p5 = scmp.ne.s32.totalorder %s658_s13, %s654_s12 }
   0xe   : > { %p61_p6 = scmp.eq.s32.totalorder %s446_s20, 0  ;;  %p140_p7 = scmp.eq.s32.totalorder %s446_s20, 3 }
   0xf   : > { %s936_s23 = smov (%p40_p4, %s934_s23), 0  ;;  %p146_p10 = scmp.eq.s32.totalorder %s447_s21, 3 }
  0x10   : > { %p770_p8 = por %p61_p6, %p60_p5  ;;  %p774_p9 = por %p140_p7, %p54_p1 }
  0x11   : > { %s42_s29 = ssub.s32 %s678_s18, %s936_s23  ;;  %p780_p12 = por %p146_p10, %p60_p5 }
  0x12   : > { %s917_s28 = scalar_select %p774_p9, 1, 0 }
  0x13   : > { %s44_s30 = sor.u32 %s43_s25, %s42_s29  ;;  %p484_p13 = scmp.lt.s32.totalorder %s682_s19, 4 }
  0x14   : > { %p45_p11 = scmp.eq.s32.totalorder %s44_s30, 0  ;;  %s180_s5 = sand.u32 1, %s662_s14  }
  0x15   : > { %s918_s4 = scalar_select %p780_p12, 1, 0 }
  0x16   : > { %s787_s6 = scalar_select %p45_p11, %s662_s14, %s47_s24  }
  0x17   : > { %s452_s7 = sshll.u32 %s180_s5, 2  ;;  %s453_s8 = sshll.u32 %s678_s18, 1 }
  0x18   : > { %s189_s9 = sadd.s32 %s674_s17, %s453_s8  ;;  %s184_s10 = scalar_lea.vmem [#allocation2], %s452_s7 }
  0x19   : > { %s193_s11 = sshll.u32 %s184_s10, 4  ;;  %s454_s20 = sshll.u32 %s189_s9, 6  ;;  %s791_s11 = int_to_ptr.vmem [resolvable:$true] %s193_s11 }
  0x1a   : > { %s796_s29 = scalar_lea.hbm %s910_s0, %s454_s20  ;;  %p800_p0 = pnand %p484_p13, %p762_p3 }
  0x1b   : > { %s181_s30 = scalar_lea.sflag [#allocation3], %s180_s5  ;;  %s554_s7 = scalar_lea.hbm %s796_s29, 64 }
  0x1c   : > { %p555_p4 = scmp.ne.s32.totalorder %s796_s29, %s554_s7  ;;  %p556_p5 = pneg %p800_p0 }
  0x1d   : > { %s559_s9 = scalar_lea.hbm %s910_s0, 256  ;;  %p560_p3 = scmp.lt.u32.totalorder %s796_s29, %s910_s0 }
  0x1e   : > { %p557_p6 = pnand %p556_p5, %p555_p4  ;;  %p561_p10 = scmp.lt.u32.totalorder %s559_s9, %s554_s7 }
  0x1f   : > { %p563_p13 = scmp.lt.u32.totalorder %s554_s7, %s796_s29 }
  0x20   : > { %p558_p7 = pneg %p557_p6  ;;  %p562_p11 = por %p561_p10, %p560_p3 }
  0x22   : > { %p564_p1 = por %p563_p13, %p562_p11 }
  0x24   : > { %p565_p2 = pnand %p564_p1, %p558_p7 }
  0x26   : > { %568 = shalt.err (!%p565_p2)
}
  0x27   : > { %s569_s5 = scalar_lea.vmem %s791_s11, 64  ;;  %s684_s21 = smov [#allocation2]  }
  0x28   : > { %p570_p4 = scmp.ne.s32.totalorder %s791_s11, %s569_s5  ;;  %s574_s25 = sshll.u32 %s684_s21, 4  ;;  %s575_s25 = int_to_ptr.vmem [resolvable:$false] %s574_s25 }
  0x29   : > { %s576_s26 = scalar_lea.vmem %s575_s25, 128  ;;  %p577_p9 = scmp.lt.s32.totalorder %s791_s11, %s575_s25 }
  0x2a   : > { %p572_p6 = pnand %p570_p4, %p556_p5  ;;  %p578_p3 = scmp.lt.s32.totalorder %s576_s26, %s569_s5 }
  0x2c   : > { %p573_p12 = pneg %p572_p6  ;;  %p579_p10 = por %p578_p3, %p577_p9 }
  0x2e   : > { %p580_p11 = pnand %p579_p10, %p573_p12 }
  0x30   : > { %583 = shalt.err (!%p580_p11)
}
  0x31   : > { %479 = dma.hbm_to_vmem [thread:$0]  (!%p800_p0), %s796_s29, 64, %s791_s11, %s181_s30  }
  0x32   : > { %p920_p1 = scmp.lt.s32.totalorder %s682_s19, 5  ;;  %p921_p2 = scmp.ge.s32.totalorder %s682_s19, 1 }
  0x34   : > { %p199_p5 = pnand %p921_p2, %p920_p1 }
  0x35   : > { %s836_s7 = sand.u32 (!%p199_p5), 1, %s658_s13  }
  0x36   : > { %202 = sbr.rel (%p199_p5) target bundleno = 302 (0x12e), region = 32  ;;  %s456_s8 = sshll.u32 (!%p199_p5), %s836_s7, 2 }
  0x37   : > { %s205_s9 = scalar_lea.sflag (!%p199_p5), [#allocation3], %s836_s7  ;;  %s208_s10 = scalar_lea.vmem (!%p199_p5), [#allocation2], %s456_s8 }
  0x3d   : > { %645 = dma.done.wait (%p770_p8), %s205_s9, 64  }
  0x3e   : > { %647 = vsyncadd (%p770_p8), %s205_s9, 4294967232  ;;  %v685_v0 = vmov 0.0   ;;  %vm686_vm0 = vmmov 0   ;;  %v687_v1 = vmov 0   ;;  %vm260_vm1 = vcmask 1043456   ;;  %s457_s30 = sshll.u32 %s836_s7, 1 }
  0x3f   : > { %466 = vmatprep.subr.bf16.mxu0 %v685_v0  ;;  %468 = vmatprep.mubr.msk.bf16.mxu0 %vm686_vm0, %v685_v0  ;;  %v249_v2 = vld [vmem:[%s208_s10] sm:$0xf]  ;;  %vm256_vm2 = vcmask 64512   ;;  %s460_s20 = sshll.u32 %s670_s16, 1  ;;  %s238_s25 = scalar_lea.vmem [#allocation5], %s457_s30 }
  0x40   : > { %553 = vset.pattern.permute.xlu0 %v687_v1  ;;  %v250_v3 = vld [vmem:[%s912_s2] sm:$0xf]  ;;  %v262_v4 = vsel %vm260_vm1, %v249_v2, 0  ;;  %s322_s5 = sadd.s32 %s666_s15, %s460_s20  ;;  %s326_s26 = sshll.u32 %s238_s25, 4  ;;  %s858_s26 = int_to_ptr.vmem [resolvable:$true] %s326_s26 }
  0x41   : > { %253 = vperm.xlu0 %553, %v250_v3   ;;  %467 = vmatpush3.bf16.msra.mxu0 %v262_v4  ;;  %v248_v5 = vld [vmem:[%s911_s1] sm:$0x3]  ;;  %s461_s21 = sshll.u32 %s322_s5, 5  ;;  %s309_s15 = scalar_lea.sflag [#allocation4], %s836_s7 }
  0x42   : > { %s856_s10 = scalar_lea.hbm %s913_s3, %s461_s21  ;;  %s584_s16 = scalar_lea.vmem %s858_s26, 32 }
  0x43   : > { %p585_p8 = scmp.ne.s32.totalorder %s858_s26, %s584_s16  ;;  %p922_p9 = scmp.ne.s32.totalorder %s917_s28, 0 }
  0x44   : > { %469 = vmatmul.mubr.msk.bf16.vlgmr.msra.gmra.mrb[0].mxu0 %vm256_vm2, %v248_v5  ;;  %s688_s11 = smov [#allocation5]  }
  0x45   : > { %p586_p12 = pnand %p585_p8, %p922_p9  ;;  %s588_s29 = sshll.u32 %s688_s11, 4  ;;  %s589_s29 = int_to_ptr.vmem [resolvable:$false] %s588_s29 }
  0x46   : > { %s590_s27 = scalar_lea.vmem %s589_s29, 64  ;;  %p591_p7 = scmp.lt.s32.totalorder %s858_s26, %s589_s29 }
  0x47   : > { %p587_p0 = pneg %p586_p12  ;;  %p592_p13 = scmp.lt.s32.totalorder %s590_s27, %s584_s16 }
  0x49   : > { %p593_p4 = por %p592_p13, %p591_p7 }
  0x4b   : > { %p594_p6 = pnand %p593_p4, %p587_p0 }
  0xc0   : > { %v254_v6 = vpop.permute.xlu0 %253 }
 0x117   : > { %v298_v7 = vpop.f32.mrb[0].mxu0 }
 0x118   : > { %v299_v8 = vadd.f32 %v298_v7, %v254_v6  ;;  %v470_v9 = vpop.f32.mrb[1].mxu0 }
 0x119   : > { %v301_v10 = vpop.f32.mrb[2].mxu0 }
 0x11a   : > { %v304_v11 = vmul.f32 0.1, %v299_v8  ;;  %v471_v12 = vpop.f32.mrb[3].mxu0 }
 0x11c   : > { %v305_v13 = vmax.f32 %v299_v8, %v304_v11 }
 0x11e   : > { %v306_v14 = vpack.c.bf16 %v305_v13, %v305_v13 }
 0x120   : > { %307 = vst [vmem:[%s238_s25] sm:$0x3] %v306_v14 }
 0x121   : > { %597 = shalt.err (!%p594_p6)
}
 0x122   : > { %s598_s7 = scalar_lea.hbm %s856_s10, 32  ;;  %s602_s20 = scalar_lea.hbm %s913_s3, 128 }
 0x123   : > { %p599_p3 = scmp.ne.s32.totalorder %s856_s10, %s598_s7  ;;  %p603_p1 = scmp.lt.u32.totalorder %s856_s10, %s913_s3 }
 0x124   : > { %p604_p2 = scmp.lt.u32.totalorder %s602_s20, %s598_s7  ;;  %p606_p8 = scmp.lt.u32.totalorder %s598_s7, %s856_s10 }
 0x125   : > { %p600_p10 = pnand %p599_p3, %p922_p9 }
 0x126   : > { %p605_p5 = por %p604_p2, %p603_p1 }
 0x127   : > { %p601_p11 = pneg %p600_p10 }
 0x128   : > { %p607_p12 = por %p606_p8, %p605_p5 }
 0x12a   : > { %p608_p0 = pnand %p607_p12, %p601_p11 }
 0x12c   : > { %611 = shalt.err (!%p608_p0)
}
 0x12d   : > { %474 = dma.vmem_to_hbm [thread:$0]  (%p922_p9), %s858_s26, 32, %s856_s10, %s309_s15  }
 0x12e PF: > { %p485_p7 = scmp.ge.s32.totalorder %s682_s19, 2  ;;  %s338_s25 = sand.u32 1, %s654_s12  }
 0x12f   : > { %p923_p13 = scmp.ne.s32.totalorder %s918_s4, 0  ;;  %s339_s8 = scalar_lea.sflag [#allocation4], %s338_s25 }
 0x131   : > { %p481_p4 = pnand %p485_p7, %p923_p13 }
 0x133   : > { %649 = dma.done.wait (!%p481_p4), %s339_s8, 32  }
 0x134   : > { %651 = vsyncadd (!%p481_p4), %s339_s8, 4294967264  ;;  %s19_s19 = sadd.s32 1, %s682_s19   ;;  %s924_s12 = smov %s658_s13 }
 0x135   : > { %p16_p6 = scmp.ge.s32.totalorder %s19_s19, 6   ;;  %s925_s13 = smov %s662_s14 }
 0x136   : > { %s926_s14 = smov %s787_s6  ;;  %s927_s15 = smov %s674_s17 }
 0x137   : > { %s928_s16 = smov %s678_s18  ;;  %s929_s17 = smov %s932_s22 }
 0x138   : > { %s930_s18 = smov %s936_s23  ;;  %18 = sbr.rel (!%p16_p6) target bundleno = 7 (0x7), region = 83 }
 0x13f   :  { %344 = vsyncpa [#allocation3], 1 }
 0x140   :  { %346 = vsyncpa [#allocation3 + $0x1], 1 }
 0x141   :  { %347 = vsyncpa [#allocation4], 1 }
 0x142   :  { %349 = vsyncpa [#allocation4 + $0x1], 1 }

</bundles_post_ra>
